<compile_context>
chip_gen: v7x
topology: tpu7x:2x2x1
jax: 0.10.0
libtpu: 0.0.40
codegen_flags: <defaults>
</compile_context>

<pallas_src>
import jax
import jax.numpy as jnp
from jax.experimental import pallas as pl
from jax.experimental.pallas import tpu as pltpu

_MASK_TOKEN_ID = 102  # token id treated as padding/SEP (excluded from the mean pooling)


def _mean_pool_proj_kernel(ids_ref, x_ref, w_ref, b_ref, o_ref):
    """One batch tile: masked mean over S, then project to the (lane-padded) output width."""
    x = x_ref[...]                                                    # (Bm, S, D) f32
    mask = (ids_ref[...] != _MASK_TOKEN_ID).astype(jnp.float32)       # (Bm, S)

    # Masked sum over S on the MXU: (Bm, 1, S) @ (Bm, S, D) -> (Bm, 1, D).
    num = jnp.einsum(
        "bqs,bsd->bqd", mask[:, None, :], x,
        preferred_element_type=jnp.float32)[:, 0, :]                  # (Bm, D)

    # Valid-token count per row; guard rows where every token is masked (avoids Inf/NaN).
    den = jnp.maximum(jnp.sum(mask, axis=1, keepdims=True), 1.0)      # (Bm, 1)
    pooled = num * pl.reciprocal(den, approx=True)                    # (Bm, D)

    out = jnp.dot(pooled, w_ref[...], preferred_element_type=jnp.float32)  # (Bm, O_pad)
    o_ref[...] = (out + b_ref[...]).astype(o_ref.dtype)


def _cls_pool_proj_kernel(xc_ref, w_ref, b_ref, o_ref):
    """CLS pooling: the wrapper already sliced x[:, 0, :]; just project + bias."""
    out = jnp.dot(xc_ref[...], w_ref[...], preferred_element_type=jnp.float32)
    o_ref[...] = (out + b_ref[...]).astype(o_ref.dtype)


def _pick_batch_tile(B, S, D, budget_bytes=12 << 20):
    """Largest sublane-friendly batch tile whose double-buffered tiles fit a VMEM budget.

    Budget is conservative for v7x (64 MiB physical, 32 MiB scoped default); bigger VMEM
    on v5e/v6e just gets more pipelining slack.
    """
    # Per batch row: double-buffered x (f32) + ids (i32) input tiles + the padded output row.
    row_bytes = 2 * (S * D * 4 + S * 4) + 2 * 128 * 4
    cap = max(8, budget_bytes // max(row_bytes, 1))
    for bm in (1024, 512, 256, 128, 64, 32, 16, 8):
        if bm <= cap and B % bm == 0:
            return bm
    # Small (or indivisible) batch: one whole-batch block (still satisfies the (8,128) rule
    # because the block then equals the full array dimension).
    return B


def pred_output_layer(x, input_ids, weight_t, bias, *, pooling="mean"):
    """x: (B,S,D) f32, input_ids: (B,S,3) i32, weight_t: (D,O) f32, bias: (O,) f32."""
    B, S, D = x.shape
    O = weight_t.shape[1]
    O_pad = 128 * pl.cdiv(O, 128)  # lane-dense output width (>= 128, multiple of 128)

    # One-time parameter prep (constant-folded under jit): pad W / b to the lane-dense width.
    w_pad = jnp.pad(weight_t.astype(jnp.float32), ((0, 0), (0, O_pad - O)))
    b_pad = jnp.pad(bias.astype(jnp.float32), (0, O_pad - O)).reshape(1, O_pad)

    Bm = _pick_batch_tile(B, S, D)
    grid = (B // Bm,)
    params = pltpu.CompilerParams(dimension_semantics=("parallel",))
    out_shape = jax.ShapeDtypeStruct((B, O_pad), jnp.float32)
    out_spec = pl.BlockSpec((Bm, O_pad), lambda i: (i, 0))
    w_spec = pl.BlockSpec((D, O_pad), lambda i: (0, 0))
    b_spec = pl.BlockSpec((1, O_pad), lambda i: (0, 0))

    if pooling == "mean":
        ids_col = input_ids[:, :, 1].astype(jnp.int32)  # channel used for the mask
        out = pl.pallas_call(
            _mean_pool_proj_kernel,
            out_shape=out_shape,
            grid=grid,
            in_specs=[
                pl.BlockSpec((Bm, S), lambda i: (i, 0)),        # ids tile
                pl.BlockSpec((Bm, S, D), lambda i: (i, 0, 0)),  # x tile
                w_spec,
                b_spec,
            ],
            out_specs=out_spec,
            compiler_params=params,
        )(ids_col, x, w_pad, b_pad)
    elif pooling == "cls":
        # CLS path: never touches input_ids, and only the first token of each sequence is
        # read from x (sliced in the wrapper -> no wasted HBM traffic inside the kernel).
        x_cls = x[:, 0, :]
        out = pl.pallas_call(
            _cls_pool_proj_kernel,
            out_shape=out_shape,
            grid=grid,
            in_specs=[pl.BlockSpec((Bm, D), lambda i: (i, 0)), w_spec, b_spec],
            out_specs=out_spec,
            compiler_params=params,
        )(x_cls, w_pad, b_pad)
    else:
        raise ValueError(f"unsupported pooling: {pooling}")

    # Drop the lane padding, then match torch's `.squeeze()` on the projection output.
    return jnp.squeeze(out[:, :O])


def _reference(x, input_ids, weight_t, bias, pooling="mean"):
    if pooling == "mean":
        mask = (input_ids[:, :, 1] != _MASK_TOKEN_ID).astype(jnp.float32)[:, :, None]
        mask = jnp.broadcast_to(mask, x.shape)
        # Same all-masked-row guard as the kernel (torch would produce NaN there).
        pooled = (x * mask).sum(axis=1) / jnp.maximum(mask.sum(axis=1), 1.0)
    else:
        pooled = x[:, 0, :]
    return jnp.squeeze(pooled @ weight_t + bias)


if __name__ == "__main__":
    # args.pred_dim = 32, args.pred_target = 'dx' (-> 18 outputs), args.pred_pooling = 'mean'
    B, S, D, O = 2, 8, 32, 18

    key = jax.random.PRNGKey(0)
    kx, kid, kw, kb = jax.random.split(key, 4)

    x = jax.random.normal(kx, (B, S, D), dtype=jnp.float32)

    # input_ids (B, S, 3); channel 1 carries token ids, some equal to 102 (masked out).
    ids_ch1 = jax.random.randint(kid, (B, S), 100, 105, dtype=jnp.int32)
    ids_ch1 = ids_ch1.at[:, 0].set(101)  # ensure at least one non-102 token per row
    input_ids = jnp.stack(
        [jnp.zeros((B, S), jnp.int32), ids_ch1, jnp.zeros((B, S), jnp.int32)], axis=-1)

    # Deterministic nn.Linear(pred_dim, 18)-style init (uniform +/- 1/sqrt(fan_in)).
    bound = 1.0 / (D ** 0.5)
    weight = jax.random.uniform(kw, (O, D), minval=-bound, maxval=bound, dtype=jnp.float32)
    bias = jax.random.uniform(kb, (O,), minval=-bound, maxval=bound, dtype=jnp.float32)
    weight_t = weight.T  # (D, O): kernel computes pooled @ W^T

    # --- mean pooling path ---
    out_mean = jax.block_until_ready(
        pred_output_layer(x, input_ids, weight_t, bias, pooling="mean"))
    ref_mean = _reference(x, input_ids, weight_t, bias, pooling="mean")
    assert out_mean.shape == ref_mean.shape, (out_mean.shape, ref_mean.shape)
    # Tolerance covers the EUP approximate reciprocal used for the mean denominator.
    assert jnp.allclose(out_mean, ref_mean, atol=5e-3, rtol=1e-3), \
        float(jnp.max(jnp.abs(out_mean - ref_mean)))

    # --- cls pooling path (separate specialization, no ids operand) ---
    out_cls = jax.block_until_ready(
        pred_output_layer(x, input_ids, weight_t, bias, pooling="cls"))
    ref_cls = _reference(x, input_ids, weight_t, bias, pooling="cls")
    assert out_cls.shape == ref_cls.shape, (out_cls.shape, ref_cls.shape)
    assert jnp.allclose(out_cls, ref_cls, atol=1e-5, rtol=1e-5), \
        float(jnp.max(jnp.abs(out_cls - ref_cls)))

    print("KERNEL_OK")
</pallas_src>

<mosaic_0001>
module attributes {stable_mosaic.version = 11 : i64} {
  func.func @_mean_pool_proj_kernel(%arg0: i32, %arg1: memref<2x8xi32, #tpu.memory_space<vmem>>, %arg2: memref<2x8x32xf32, #tpu.memory_space<vmem>>, %arg3: memref<32x128xf32, #tpu.memory_space<vmem>>, %arg4: memref<1x128xf32, #tpu.memory_space<vmem>>, %arg5: memref<2x128xf32, #tpu.memory_space<vmem>>) attributes {dimension_semantics = [#tpu.dimension_semantics<parallel>], iteration_bounds = array<i64: 1>, scalar_prefetch = 0 : i64, scratch_operands = 0 : i64, tpu.core_type = #tpu.core_type<tc>, window_params = [{transform_indices = @transform_0, window_bounds = array<i64: 2, 8>}, {transform_indices = @transform_1, window_bounds = array<i64: 2, 8, 32>}, {pipeline_mode = #tpu.pipeline_mode<synchronous>, transform_indices = @transform_2, window_bounds = array<i64: 32, 128>}, {pipeline_mode = #tpu.pipeline_mode<synchronous>, transform_indices = @transform_3, window_bounds = array<i64: 1, 128>}, {transform_indices = @transform_4, window_bounds = array<i64: 2, 128>}]} {
    %c0 = arith.constant 0 : index
    %c0_0 = arith.constant 0 : index
    %c0_1 = arith.constant 0 : index
    %0 = vector.load %arg2[%c0, %c0_0, %c0_1] : memref<2x8x32xf32, #tpu.memory_space<vmem>>, vector<2x8x32xf32>
    %c0_2 = arith.constant 0 : index
    %c0_3 = arith.constant 0 : index
    %1 = vector.load %arg1[%c0_2, %c0_3] : memref<2x8xi32, #tpu.memory_space<vmem>>, vector<2x8xi32>
    %c102_i32 = arith.constant 102 : i32
    %2 = vector.broadcast %c102_i32 : i32 to vector<2x8xi32>
    %3 = arith.cmpi ne, %1, %2 : vector<2x8xi32>
    %4 = arith.extui %3 : vector<2x8xi1> to vector<2x8xi32>
    %5 = arith.sitofp %4 : vector<2x8xi32> to vector<2x8xf32>
    %6 = vector.shape_cast %5 : vector<2x8xf32> to vector<2x1x8xf32>
    "tpu.trace_start"() <{level = 10 : i32, message = "bqs,bsd->bqd"}> : () -> ()
    %cst = arith.constant dense<0.000000e+00> : vector<2x1x32xf32>
    %7 = tpu.matmul %6, %0, %cst {dimension_numbers = #tpu.dot_dimension_numbers<[2], [1], [1], [2], [0, 0, 0, 1, 1, 2], [0], [0]>} : vector<2x1x8xf32>, vector<2x8x32xf32>, vector<2x1x32xf32> -> vector<2x1x32xf32>
    "tpu.trace_stop"() : () -> ()
    %8 = vector.shape_cast %7 : vector<2x1x32xf32> to vector<2x32xf32>
    %cst_4 = arith.constant dense<0.000000e+00> : vector<2xf32>
    %9 = vector.multi_reduction <add>, %5, %cst_4 [1] : vector<2x8xf32> to vector<2xf32>
    %10 = vector.shape_cast %9 : vector<2xf32> to vector<2x1xf32>
    %cst_5 = arith.constant 1.000000e+00 : f32
    %11 = vector.broadcast %cst_5 : f32 to vector<2x1xf32>
    %12 = arith.maximumf %10, %11 : vector<2x1xf32>
    %13 = tpu.reciprocal %12 {approx = true} : vector<2x1xf32> -> vector<2x1xf32>
    %14 = vector.broadcast %13 : vector<2x1xf32> to vector<2x32xf32>
    %15 = arith.mulf %8, %14 : vector<2x32xf32>
    %c0_6 = arith.constant 0 : index
    %c0_7 = arith.constant 0 : index
    %16 = vector.load %arg3[%c0_6, %c0_7] : memref<32x128xf32, #tpu.memory_space<vmem>>, vector<32x128xf32>
    %cst_8 = arith.constant dense<0.000000e+00> : vector<2x128xf32>
    %17 = tpu.matmul %15, %16, %cst_8 {dimension_numbers = #tpu.dot_dimension_numbers<[1], [0], [0], [1], [0, 0, 1, 1], [], []>} : vector<2x32xf32>, vector<32x128xf32>, vector<2x128xf32> -> vector<2x128xf32>
    %c0_9 = arith.constant 0 : index
    %c0_10 = arith.constant 0 : index
    %18 = vector.load %arg4[%c0_9, %c0_10] : memref<1x128xf32, #tpu.memory_space<vmem>>, vector<1x128xf32>
    %19 = vector.broadcast %18 : vector<1x128xf32> to vector<2x128xf32>
    %20 = arith.addf %17, %19 : vector<2x128xf32>
    %c0_11 = arith.constant 0 : index
    %c0_12 = arith.constant 0 : index
    %21 = vector.load %arg5[%c0_11, %c0_12] : memref<2x128xf32, #tpu.memory_space<vmem>>, vector<2x128xf32>
    tpu.vector_store %arg5[%c0_11, %c0_12], %20 {strides = array<i32>} : memref<2x128xf32, #tpu.memory_space<vmem>>, vector<2x128xf32>,
    return
  }
  func.func @transform_0(%arg0: i32) -> (i32, i32) {
    %c0_i32 = arith.constant 0 : i32
    %c0_i32_0 = arith.constant 0 : i32
    return %arg0, %c0_i32 : i32, i32
  }
  func.func @transform_1(%arg0: i32) -> (i32, i32, i32) {
    %c0_i32 = arith.constant 0 : i32
    %c0_i32_0 = arith.constant 0 : i32
    %c0_i32_1 = arith.constant 0 : i32
    return %arg0, %c0_i32, %c0_i32_0 : i32, i32, i32
  }
  func.func @transform_2(%arg0: i32) -> (i32, i32) {
    %c0_i32 = arith.constant 0 : i32
    %c0_i32_0 = arith.constant 0 : i32
    %c0_i32_1 = arith.constant 0 : i32
    return %c0_i32, %c0_i32_0 : i32, i32
  }
  func.func @transform_3(%arg0: i32) -> (i32, i32) {
    %c0_i32 = arith.constant 0 : i32
    %c0_i32_0 = arith.constant 0 : i32
    %c0_i32_1 = arith.constant 0 : i32
    return %c0_i32, %c0_i32_0 : i32, i32
  }
  func.func @transform_4(%arg0: i32) -> (i32, i32) {
    %c0_i32 = arith.constant 0 : i32
    %c0_i32_0 = arith.constant 0 : i32
    return %arg0, %c0_i32 : i32, i32
  }
}

</mosaic_0001>

<bundles_post_ra>
// kernel: tpu_custom_call.1
= control target key start
LH: loop header
LB: loop body
LE: loop exit
PB: predicated region body
PF: predicated region fallthrough
CT: control target
= control target key end

     0   :  { %9 = vsyncpa [#allocation3], 0  ;;  %s591_s0 = inlined_call_operand.hbm [shape: s32[2,8], index: 0, kind: input, shape index: {}]   ;;  %s592_s1 = inlined_call_operand.hbm [shape: f32[2,8,32], index: 1, kind: input, shape index: {}]   ;;  %s593_s2 = inlined_call_operand.hbm [shape: f32[32,128], index: 2, kind: input, shape index: {}]   ;;  %s594_s3 = inlined_call_operand.vmem [shape: f32[1,128], index: 3, kind: input, shape index: {}]   ;;  %s595_s4 = inlined_call_operand.hbm [shape: f32[2,128], index: 4, kind: output, shape index: {}]  }
   0x1   :  { %10 = vsyncpa [#allocation6], 0 }
   0x2   :  { %11 = vsyncpa [#allocation4], 0  ;;  %s496_s15 = smov [#allocation5]   ;;  %s402_s19 = scalar_lea.hbm %s592_s1, 256 }
   0x3   :  { %s27_s16 = sshll.u32 %s496_s15, 4  ;;  %p403_p0 = scmp.ne.s32.totalorder %s592_s1, %s402_s19  ;;  %s28_s16 = int_to_ptr.vmem [resolvable:$true] %s27_s16 }
   0x4   :  { %p406_p1 = scmp.lt.u32.totalorder %s402_s19, %s592_s1 }
   0x6   :  { %p408_p2 = pnand %p406_p1, %p403_p0 }
   0x8   :  { %411 = shalt.err (!%p408_p2)
}
   0x9   :  { %s412_s24 = scalar_lea.vmem %s28_s16, 256  ;;  %p417_p4 = scmp.lt.s32.totalorder %s28_s16, %s28_s16 }
   0xa   :  { %p413_p3 = scmp.ne.s32.totalorder %s28_s16, %s412_s24  ;;  %p418_p5 = scmp.lt.s32.totalorder %s412_s24, %s412_s24 }
   0xc   :  { %p419_p6 = por %p418_p5, %p417_p4 }
   0xe   :  { %p420_p7 = pnand %p419_p6, %p413_p3 }
  0x10   :  { %423 = shalt.err (!%p420_p7)
}
  0x11   :  { %s497_s25 = smov 128   ;;  %s498_s26 = smov 8  }
  0x12   :  { %33 = dma.hbm_to_vmem [thread:$0]  %s592_s1, 256, %s28_s16, [#allocation6], %s497_s25, %s497_s25, %s498_s26  }
  0x13   :  { %s499_s29 = smov [#allocation2]   ;;  %s500_s5 = smov [#allocation7]  }
  0x14   :  { %s18_s30 = sshll.u32 %s499_s29, 4  ;;  %s39_s6 = sshll.u32 %s500_s5, 4  ;;  %s19_s30 = int_to_ptr.vmem [resolvable:$true] %s18_s30  ;;  %s40_s6 = int_to_ptr.vmem [resolvable:$true] %s39_s6 }
  0x15   :  { %s424_s9 = scalar_lea.hbm %s591_s0, 32 }
  0x16   :  { %p425_p8 = scmp.ne.s32.totalorder %s591_s0, %s424_s9  ;;  %p428_p9 = scmp.lt.u32.totalorder %s424_s9, %s591_s0 }
  0x18   :  { %p430_p10 = pnand %p428_p9, %p425_p8 }
  0x1a   :  { %433 = shalt.err (!%p430_p10)
}
  0x1b   :  { %s434_s1 = scalar_lea.vmem %s19_s30, 32  ;;  %p439_p12 = scmp.lt.s32.totalorder %s19_s30, %s19_s30 }
  0x1c   :  { %p435_p11 = scmp.ne.s32.totalorder %s19_s30, %s434_s1  ;;  %p440_p13 = scmp.lt.s32.totalorder %s434_s1, %s434_s1 }
  0x1e   :  { %p441_p0 = por %p440_p13, %p439_p12 }
  0x20   :  { %p442_p1 = pnand %p441_p0, %p435_p11 }
  0x22   :  { %445 = shalt.err (!%p442_p1)
}
  0x23   :  { %21 = dma.hbm_to_vmem [thread:$0]  %s591_s0, 32, %s19_s30, [#allocation3]  }
  0x24   :  { %s446_s18 = scalar_lea.hbm %s593_s2, 512 }
  0x25   :  { %p447_p2 = scmp.ne.s32.totalorder %s593_s2, %s446_s18  ;;  %p450_p3 = scmp.lt.u32.totalorder %s446_s18, %s593_s2 }
  0x27   :  { %p452_p4 = pnand %p450_p3, %p447_p2 }
  0x29   :  { %455 = shalt.err (!%p452_p4)
}
  0x2a   :  { %s456_s23 = scalar_lea.vmem %s40_s6, 512  ;;  %p461_p6 = scmp.lt.s32.totalorder %s40_s6, %s40_s6 }
  0x2b   :  { %p457_p5 = scmp.ne.s32.totalorder %s40_s6, %s456_s23  ;;  %p462_p7 = scmp.lt.s32.totalorder %s456_s23, %s456_s23 }
  0x2d   :  { %p463_p8 = por %p462_p7, %p461_p6 }
  0x2f   :  { %p464_p9 = pnand %p463_p8, %p457_p5 }
  0x31   :  { %467 = shalt.err (!%p464_p9)
}
  0x32   :  { %45 = dma.hbm_to_vmem [thread:$0]  %s593_s2, 512, %s40_s6, [#allocation6], %s497_s25, %s497_s25, %s498_s26  }
  0x33   :  { %490 = dma.done.wait [#allocation3], 32  }
  0x34   :  { %491 = vsyncadd [#allocation3], 4294967264 }
  0x35   :  { %492 = dma.done.wait [#allocation6], 768  }
  0x36   :  { %493 = vsyncadd [#allocation6], 4294966528  ;;  %v67_v0 = vlaneseq  ;;  %v501_v1 = vmov 0.0   ;;  %vm502_vm0 = vmmov 0   ;;  %v503_v2 = vmov 1966171168  }
  0x37   :  { %363 = vmatprep.subr.mxu1 %v501_v1  ;;  %365 = vmatprep.mubr.msk.f32.mxu1 %vm502_vm0, %v501_v1  ;;  %v65_v3 = vunpack.c.l.s4 %v503_v2  ;;  %v57_v7 = vld [vmem:[#allocation5] sm:$0xff]  ;;  %v59_v8 = vld [vmem:[#allocation2] sm:$0x3]  ;;  %vm231_vm1 = vcmask 58368   ;;  %vm86_vm3 = vcmask 64512   ;;  %v58_v14 = vld [vmem:[#allocation5 + $0x8] sm:$0xff] }
  0x38   :  { %v68_v4 = vshrl.u32 %v67_v0, 7  ;;  %381 = vmatprep.mubr.msk.f32.mxu0 %vm502_vm0, %v501_v1  ;;  %364 = vmatpush3.msra.mxu1 %v57_v7  ;;  %vm60_vm2 = vcmp.ne.s32.totalorder %v59_v8, 102  ;;  %v243_v16 = vld [vmem:[#allocation7] sm:$0xff]  ;;  %v244_v17 = vld [vmem:[#allocation7 + $0x8] sm:$0xff]  ;;  %v504_v19 = vmov 0.0|0.0   ;;  %v245_v20 = vld [vmem:[#allocation7 + $0x10] sm:$0xff] }
  0x39   :  { %v66_v5 = vunpack.c.0.s8 %v65_v3  ;;  %368 = vmatprep.subr.mxu1 %v501_v1  ;;  %v349_v9 = vsel %vm60_vm2, 1.0, %v501_v1  ;;  %v385_v18 = vpack.c.bf16 %v244_v17, %v243_v16  ;;  %384 = vmatprep.subr.bf16.mxu0 %v504_v19  ;;  %v246_v21 = vld [vmem:[#allocation7 + $0x18] sm:$0xff]  ;;  %vm257_vm4 = vcmask 1041409   ;;  %v352_v35 = vld [vmem:[%s594_s3] ss:$0 sm:$0xff]  ;;  %s505_s26 = smov [#allocation8]  }
  0x3a   :  { %v232_v11 = vsel %vm231_vm1, %v349_v9, 0.0  ;;  %v388_v22 = vpack.c.bf16 %v246_v21, %v245_v20  ;;  %vm259_vm5 = vcmask 261120   ;;  %s339_s27 = sshll.u32 %s505_s26, 4  ;;  %s340_s27 = int_to_ptr.vmem [resolvable:$true] %s339_s27 }
  0x3b   :  { %v69_v6 = vsub.s32 %v66_v5, %v68_v4  ;;  %233 = vadd.xlane.f32.xlu0 %v232_v11  ;;  %386 = vmatpush3.bf16.msra.mxu0 %v385_v18  ;;  %s468_s28 = scalar_lea.vmem %s340_s27, 32  ;;  %p473_p11 = scmp.lt.s32.totalorder %s340_s27, %s340_s27 }
  0x3c   :  { %387 = vmatprep.subr.bf16.mxu0 %v504_v19  ;;  %p469_p10 = scmp.ne.s32.totalorder %s340_s27, %s468_s28  ;;  %p474_p12 = scmp.lt.s32.totalorder %s468_s28, %s468_s28 }
  0x3d   :  { %v70_v10 = vrot.slane %v349_v9, %v69_v6 }
  0x3e   :  { %p475_p13 = por %p474_p12, %p473_p11 }
  0x3f   :  { %v71_v12 = vcombine.high %v70_v10, %v70_v10  ;;  %v78_v13 = vrot.slane %v70_v10, %v69_v6  ;;  %389 = vmatpush3.bf16.msra.mxu0 %v388_v22 }
  0x40   :  { %p476_p0 = pnand %p475_p13, %p469_p10 }
  0x41   :  { %366 = vmatmul.mubr.msk.f32.vlgmr.msra.gmra.mrb[0].mxu1 %vm86_vm3, %v78_v13  ;;  %v85_v15 = vrot.slane %v71_v12, %v69_v6 }
  0x42   :  { %369 = vmatpush3.msra.mxu1 %v58_v14  ;;  %370 = vmatprep.mubr.msk.f32.mxu1 %vm502_vm0, %v501_v1 }
  0x45   :  { %371 = vmatmul.mubr.msk.f32.vlgmr.msra.gmra.mrb[2].mxu1 %vm86_vm3, %v85_v15 }
  0xc8   :  { %v234_v23 = vpop.xlane.xlu0 %233 }
  0xc9   :  { %v235_v24 = vmax.f32 %v234_v23, 1.0 }
  0xcb   :  { %400 = vrcp.f32 %v235_v24 }
  0xd5   :  { %v401_v25 = vpop.eup %400 }
  0xd6   :  { %v238_v28 = vrot.slane %v401_v25, 1 }
 0x114   :  { %v155_v26 = vpop.f32.mrb[0].mxu1 }
 0x115   :  { %v367_v27 = vpop.f32.mrb[1].mxu1  ;;  %v241_v32 = vmul.f32 %v401_v25, %v155_v26 }
 0x118   :  { %v227_v29 = vpop.f32.mrb[2].mxu1 }
 0x119   :  { %v242_v30 = vmul.f32 %v238_v28, %v227_v29  ;;  %v372_v31 = vpop.f32.mrb[3].mxu1 }
 0x11b   :  { %v256_v33 = vrot.slane %v242_v30, 7 }
 0x11d   :  { %v258_v34 = vsel %vm257_vm4, %v256_v33, %v241_v32 }
 0x11e   :  { %382 = vmatmul.mubr.msk.f32.vlgmr.msra.gmra.mrb[0].mxu0 %vm259_vm5, %v258_v34 }
 0x1f1   :  { %v328_v36 = vpop.f32.mrb[0].mxu0 }
 0x1f2   :  { %v329_v37 = vadd.f32 %v352_v35, %v328_v36  ;;  %v383_v38 = vpop.f32.mrb[1].mxu0 }
 0x1f4   :  { %332 = vst [vmem:[#allocation8] sm:$0x3] %v329_v37 }
 0x1f5   :  { %479 = shalt.err (!%p476_p0)
}
 0x1f6   :  { %s480_s5 = scalar_lea.hbm %s595_s4, 32 }
 0x1f7   :  { %p481_p1 = scmp.ne.s32.totalorder %s595_s4, %s480_s5  ;;  %p484_p2 = scmp.lt.u32.totalorder %s480_s5, %s595_s4 }
 0x1f9   :  { %p486_p3 = pnand %p484_p2, %p481_p1 }
 0x1fb   :  { %489 = shalt.err (!%p486_p3)
}
 0x1fc   :  { %342 = dma.vmem_to_hbm [thread:$0]  %s340_s27, 32, %s595_s4, [#allocation4]  }
 0x1fd   :  { %494 = dma.done.wait [#allocation4], 32  }
 0x1fe   :  { %495 = vsyncadd [#allocation4], 4294967264 }
 0x1ff   :  { %346 = vsyncpa [#allocation3], 1 }
 0x200   :  { %347 = vsyncpa [#allocation6], 1 }
 0x201   :  { %348 = vsyncpa [#allocation4], 1 }

</bundles_post_ra>
